<compile_context>
chip_gen: v6e
topology: v6e:2x2x1
jax: 0.10.0
libtpu: 0.0.40
codegen_flags: <defaults>
</compile_context>

<pallas_src>
import jax
import jax.numpy as jnp
from jax.experimental import pallas as pl
from jax.experimental.pallas import tpu as pltpu

FOCUSING_PARAM = 2  # matches FocalLoss(focusing_param=2); applied by explicit squaring

_LANE = 128
_SUBLANE = 8
_MAX_TILE_N = 4096
_WORKING_SET_BUDGET = 24 * 1024 * 1024   # target per-step VMEM working set
_VMEM_LIMIT_BYTES = 48 * 1024 * 1024     # < v7x 64 MiB phys; > default scoped on v5e/v6e


def _round_up(x: int, m: int) -> int:
    return (x + m - 1) // m * m


def _focal_partial_kernel(logits_ref, target_ref, psum_ref, acc_ref):
    """Accumulates sum_i log softmax(logits_i)[target_i] over this core's tiles."""
    ti = pl.program_id(1)

    @pl.when(ti == 0)
    def _init():
        acc_ref[0] = jnp.float32(0.0)

    x = logits_ref[...].astype(jnp.float32)            # (tile_n, C) f32 in VMEM
    t = target_ref[...]                                 # (tile_n, 1) int32
    tn, c = x.shape

    # Row-wise numerically stable softmax pieces. Everything below is per-row,
    # so garbage in the (unread) ragged-tile rows stays confined to those rows.
    m = jnp.max(x, axis=-1, keepdims=True)              # (tile_n, 1)
    xc = x - m
    sumexp = jnp.sum(jnp.exp(xc), axis=-1, keepdims=True)

    # Gather the (max-shifted) target logit with a select; no one-hot cast/mul.
    class_ids = jax.lax.broadcasted_iota(jnp.int32, (tn, c), 1)
    x_t = jnp.sum(jnp.where(class_ids == t, xc, 0.0), axis=-1, keepdims=True)

    # Row validity straight from the target column (padded/ragged rows carry -1).
    # The select blocks any NaN/Inf produced by uninitialized ragged rows.
    valid = jnp.logical_and(t >= 0, t < c)
    contrib = jnp.where(valid, x_t - jnp.log(sumexp), 0.0)

    acc_ref[0] += jnp.sum(contrib)

    @pl.when(ti == pl.num_programs(1) - 1)
    def _finalize():
        psum_ref[0, 0] = acc_ref[0]


def focal_loss(logits: jax.Array, target: jax.Array) -> jax.Array:
    """logits: (N, C) float (any float dtype), target: (N,) ints. Scalar f32 loss."""
    n, c = logits.shape
    c_lanes = _round_up(c, _LANE)
    in_itemsize = jnp.dtype(logits.dtype).itemsize

    # Batch tile from the real per-row working set:
    #   2x native-dtype input block (double buffered) + ~5 f32 temporaries.
    per_row_bytes = c_lanes * (2 * in_itemsize + 5 * 4)
    tile_n = _WORKING_SET_BUDGET // per_row_bytes
    tile_n = min(tile_n, _MAX_TILE_N, _round_up(n, _SUBLANE))
    tile_n = int(max(_SUBLANE, tile_n // _SUBLANE * _SUBLANE))

    num_tiles = pl.cdiv(n, tile_n)
    # 2-way TensorCore split only when it adds no padded tiles (v7x megacore);
    # on single-TC v5e/v6e the split is then just a harmless serial outer loop.
    core_splits = 2 if (num_tiles >= 2 and num_tiles % 2 == 0) else 1
    tiles_per_core = num_tiles // core_splits
    n_pad = num_tiles * tile_n

    # Only the tiny target vector gets padded; -1 marks invalid (ragged) rows.
    target_p = jnp.pad(target.astype(jnp.int32).reshape(n, 1),
                       ((0, n_pad - n), (0, 0)), constant_values=-1)

    partials = pl.pallas_call(
        _focal_partial_kernel,
        out_shape=jax.ShapeDtypeStruct((core_splits, 1), jnp.float32),
        grid_spec=pltpu.PrefetchScalarGridSpec(
            num_scalar_prefetch=0,
            grid=(core_splits, tiles_per_core),
            in_specs=[
                pl.BlockSpec((tile_n, c),
                             lambda ci, ti: (ci * tiles_per_core + ti, 0)),
                pl.BlockSpec((tile_n, 1),
                             lambda ci, ti: (ci * tiles_per_core + ti, 0)),
            ],
            out_specs=pl.BlockSpec((1, 1), lambda ci, ti: (ci, 0),
                                   memory_space=pltpu.MemorySpace.SMEM),
            scratch_shapes=[pltpu.SMEM((1,), jnp.float32)],
        ),
        compiler_params=pltpu.CompilerParams(
            dimension_semantics=("parallel", "arbitrary"),
            vmem_limit_bytes=_VMEM_LIMIT_BYTES,
        ),
    )(logits, target_p)

    # Scalar epilogue: combine per-core partials + mean / focal transform.
    sum_logp_t = jnp.sum(partials)
    ce = -sum_logp_t / jnp.float32(n)                  # mean cross-entropy
    logpt = -ce
    pt = jnp.exp(logpt)
    one_minus_pt = 1.0 - pt
    return -(one_minus_pt * one_minus_pt) * logpt      # focusing_param == 2


def _focal_loss_ref(logits, target):
    """Pure-JAX reference mirroring torch F.cross_entropy (mean) + focal term."""
    logp = jax.nn.log_softmax(logits.astype(jnp.float32), axis=-1)
    logp_t = jnp.take_along_axis(logp, target[:, None].astype(jnp.int32), axis=-1)[:, 0]
    ce = -jnp.mean(logp_t)
    logpt = -ce
    return -((1.0 - jnp.exp(logpt)) ** FOCUSING_PARAM) * logpt


if __name__ == "__main__":
    key = jax.random.PRNGKey(0)
    k1, k2, k3, k4 = jax.random.split(key, 4)

    # Small test matching the module's forward: (N, C) logits + int targets.
    n1, c1 = 8, 32
    logits1 = jax.random.normal(k1, (n1, c1), dtype=jnp.float32)
    target1 = jax.random.randint(k2, (n1,), 0, c1, dtype=jnp.int32)
    loss1 = jax.block_until_ready(focal_loss(logits1, target1))
    ref1 = jax.block_until_ready(_focal_loss_ref(logits1, target1))
    assert jnp.allclose(loss1, ref1, atol=1e-5, rtol=1e-5), (loss1, ref1)

    # Odd shapes (ragged last batch tile + non-128 class dim) and bf16 logits
    # (exercises the no-pad, native-dtype streaming path).
    n2, c2 = 13, 10
    logits2 = jax.random.normal(k3, (n2, c2), dtype=jnp.bfloat16)
    target2 = jax.random.randint(k4, (n2,), 0, c2, dtype=jnp.int32)
    loss2 = jax.block_until_ready(focal_loss(logits2, target2))
    ref2 = jax.block_until_ready(_focal_loss_ref(logits2, target2))
    assert jnp.allclose(loss2, ref2, atol=1e-4, rtol=1e-4), (loss2, ref2)

    print("KERNEL_OK")
</pallas_src>

<mosaic_0001>
module attributes {stable_mosaic.version = 11 : i64} {
  func.func @_focal_partial_kernel(%arg0: i32, %arg1: i32, %arg2: memref<8x32xf32, #tpu.memory_space<vmem>>, %arg3: memref<8x1xi32, #tpu.memory_space<vmem>>, %arg4: memref<1x1xf32, #tpu.memory_space<smem>>, %arg5: memref<1xf32, #tpu.memory_space<smem>>) attributes {dimension_semantics = [#tpu.dimension_semantics<parallel>, #tpu.dimension_semantics<arbitrary>], iteration_bounds = array<i64: 1, 1>, scalar_prefetch = 0 : i64, scratch_operands = 1 : i64, tpu.core_type = #tpu.core_type<tc>, window_params = [{transform_indices = @transform_0, window_bounds = array<i64: 8, 32>}, {transform_indices = @transform_1, window_bounds = array<i64: 8, 1>}, {transform_indices = @transform_2, window_bounds = array<i64: 1, 1>}]} {
    %c0_i32 = arith.constant 0 : i32
    %0 = arith.cmpi eq, %arg1, %c0_i32 : i32
    %1 = arith.extui %0 : i1 to i32
    %c0_i32_0 = arith.constant 0 : i32
    %2 = arith.cmpi ne, %1, %c0_i32_0 : i32
    scf.if %2 {
      %cst_14 = arith.constant 0.000000e+00 : f32
      %c0_15 = arith.constant 0 : index
      %38 = memref.load %arg5[%c0_15] : memref<1xf32, #tpu.memory_space<smem>>
      memref.store %cst_14, %arg5[%c0_15] : memref<1xf32, #tpu.memory_space<smem>>
    } else {
    }
    %c0 = arith.constant 0 : index
    %c0_1 = arith.constant 0 : index
    %3 = vector.load %arg2[%c0, %c0_1] : memref<8x32xf32, #tpu.memory_space<vmem>>, vector<8x32xf32>
    %c0_2 = arith.constant 0 : index
    %c0_3 = arith.constant 0 : index
    %4 = vector.load %arg3[%c0_2, %c0_3] : memref<8x1xi32, #tpu.memory_space<vmem>>, vector<8x1xi32>
    %cst = arith.constant dense<0xFF800000> : vector<8xf32>
    %5 = vector.multi_reduction <maximumf>, %3, %cst [1] : vector<8x32xf32> to vector<8xf32>
    %6 = vector.shape_cast %5 : vector<8xf32> to vector<8x1xf32>
    %7 = vector.broadcast %6 : vector<8x1xf32> to vector<8x32xf32>
    %8 = arith.subf %3, %7 : vector<8x32xf32>
    %9 = math.exp %8 : vector<8x32xf32>
    %cst_4 = arith.constant dense<0.000000e+00> : vector<8xf32>
    %10 = vector.multi_reduction <add>, %9, %cst_4 [1] : vector<8x32xf32> to vector<8xf32>
    %11 = vector.shape_cast %10 : vector<8xf32> to vector<8x1xf32>
    %12 = tpu.iota {dimensions = array<i32: 1>} : vector<8x32xi32>
    %13 = vector.broadcast %4 : vector<8x1xi32> to vector<8x32xi32>
    %14 = arith.cmpi eq, %12, %13 : vector<8x32xi32>
    %cst_5 = arith.constant 0.000000e+00 : f32
    %15 = vector.broadcast %cst_5 : f32 to vector<8x32xf32>
    %16 = arith.select %14, %8, %15 : vector<8x32xi1>, vector<8x32xf32>
    %cst_6 = arith.constant dense<0.000000e+00> : vector<8xf32>
    %17 = vector.multi_reduction <add>, %16, %cst_6 [1] : vector<8x32xf32> to vector<8xf32>
    %18 = vector.shape_cast %17 : vector<8xf32> to vector<8x1xf32>
    %c0_i32_7 = arith.constant 0 : i32
    %19 = vector.broadcast %c0_i32_7 : i32 to vector<8x1xi32>
    %20 = arith.cmpi sge, %4, %19 : vector<8x1xi32>
    %c32_i32 = arith.constant 32 : i32
    %21 = vector.broadcast %c32_i32 : i32 to vector<8x1xi32>
    %22 = arith.cmpi slt, %4, %21 : vector<8x1xi32>
    %23 = arith.andi %20, %22 : vector<8x1xi1>
    %24 = math.log %11 : vector<8x1xf32>
    %25 = arith.subf %18, %24 : vector<8x1xf32>
    %cst_8 = arith.constant 0.000000e+00 : f32
    %26 = vector.broadcast %cst_8 : f32 to vector<8x1xf32>
    %27 = arith.select %23, %25, %26 : vector<8x1xi1>, vector<8x1xf32>
    %c0_9 = arith.constant 0 : index
    %28 = memref.load %arg5[%c0_9] : memref<1xf32, #tpu.memory_space<smem>>
    %29 = vector.shape_cast %27 : vector<8x1xf32> to vector<1x8x1xf32>
    %cst_10 = arith.constant dense<0.000000e+00> : vector<1xf32>
    %30 = vector.multi_reduction <add>, %29, %cst_10 [1, 2] : vector<1x8x1xf32> to vector<1xf32>
    %31 = vector.shape_cast %30 : vector<1xf32> to vector<1x1x1xf32>
    %32 = vector.extract %31[0, 0, 0] : f32 from vector<1x1x1xf32>
    %33 = arith.addf %28, %32 : f32
    %c0_11 = arith.constant 0 : index
    %34 = memref.load %arg5[%c0_11] : memref<1xf32, #tpu.memory_space<smem>>
    memref.store %33, %arg5[%c0_11] : memref<1xf32, #tpu.memory_space<smem>>
    %c0_i32_12 = arith.constant 0 : i32
    %35 = arith.cmpi eq, %arg1, %c0_i32_12 : i32
    %36 = arith.extui %35 : i1 to i32
    %c0_i32_13 = arith.constant 0 : i32
    %37 = arith.cmpi ne, %36, %c0_i32_13 : i32
    scf.if %37 {
      %c0_14 = arith.constant 0 : index
      %38 = memref.load %arg5[%c0_14] : memref<1xf32, #tpu.memory_space<smem>>
      %c0_15 = arith.constant 0 : index
      %c0_16 = arith.constant 0 : index
      %39 = memref.load %arg4[%c0_15, %c0_16] : memref<1x1xf32, #tpu.memory_space<smem>>
      memref.store %38, %arg4[%c0_15, %c0_16] : memref<1x1xf32, #tpu.memory_space<smem>>
    } else {
    }
    return
  }
  func.func @transform_0(%arg0: i32, %arg1: i32) -> (i32, i32) {
    %c1_i32 = arith.constant 1 : i32
    %0 = arith.muli %arg0, %c1_i32 : i32
    %1 = arith.addi %0, %arg1 : i32
    %c0_i32 = arith.constant 0 : i32
    %c0_i32_0 = arith.constant 0 : i32
    return %1, %c0_i32 : i32, i32
  }
  func.func @transform_1(%arg0: i32, %arg1: i32) -> (i32, i32) {
    %c1_i32 = arith.constant 1 : i32
    %0 = arith.muli %arg0, %c1_i32 : i32
    %1 = arith.addi %0, %arg1 : i32
    %c0_i32 = arith.constant 0 : i32
    %c0_i32_0 = arith.constant 0 : i32
    return %1, %c0_i32 : i32, i32
  }
  func.func @transform_2(%arg0: i32, %arg1: i32) -> (i32, i32) {
    %c0_i32 = arith.constant 0 : i32
    %c0_i32_0 = arith.constant 0 : i32
    return %arg0, %c0_i32 : i32, i32
  }
}

</mosaic_0001>

<bundles_post_ra>
// kernel: tpu_custom_call.1
= control target key start
LH: loop header
LB: loop body
LE: loop exit
PB: predicated region body
PF: predicated region fallthrough
CT: control target
= control target key end

     0   :  { %vm54_vm0 = vcmask 261120   ;;  %s175_s0 = inlined_call_operand.vmem [shape: f32[8,32], index: 0, kind: input, shape index: {}]   ;;  %s176_s1 = inlined_call_operand.vmem [shape: s32[8,1], index: 1, kind: input, shape index: {}]   ;;  %s177_s2 = inlined_call_operand.hbm [shape: f32[1,1], index: 2, kind: output, shape index: {}]  }
   0x1   :  { %v52_v0 = vld [vmem:[%s175_s0] sm:$0xff] }
   0x2   :  { %7 = vsyncpa [#allocation4], 0  ;;  %v55_v1 = vsel %vm54_vm0, %v52_v0, -inf  ;;  %v146_v2 = vmov 0   ;;  %v53_v3 = vld [vmem:[%s176_s1] sm:$0xff]  ;;  %v64_v7 = vlaneseq  ;;  %vm82_vm5 = vcmask 7168  }
   0x3   :  { %131 = vset.pattern.permute.xlu0 %v146_v2  ;;  %vm74_vm2 = vcmp.ge.s32.totalorder %v53_v3, 0  ;;  %vm75_vm3 = vcmp.lt.s32.totalorder %v53_v3, 32  ;;  %s147_s1 = smov [#allocation3]  }
   0x4   :  { %56 = vmax.xlane.f32.xlu0 %v55_v1  ;;  %v65_v8 = vand.u32 127, %v64_v7  ;;  %vm76_vm4 = vmand %vm74_vm2, %vm75_vm3 }
  0x1a   :  { %67 = vperm.xlu0 %131, %v53_v3  }
  0x8d   :  { %v57_v4 = vpop.xlane.xlu0 %56 }
  0x8e   :  { %v58_v5 = vsub.f32 %v52_v0, %v57_v4 }
  0x90   :  { %v59_v6 = vmul.f32 1.442695, %v58_v5 }
  0x92   :  { %132 = vpow2.f32 %v59_v6 }
  0x95   :  { %v68_v9 = vpop.permute.xlu0 %67 }
  0x96   :  { %vm69_vm1 = vcmp.eq.s32.totalorder %v65_v8, %v68_v9 }
  0x97   :  { %v70_v12 = vsel %vm69_vm1, %v58_v5, 0.0 }
  0x98   :  { %v71_v13 = vsel %vm54_vm0, %v70_v12, 0.0 }
  0x9f   :  { %v133_v10 = vpop.eup %132 }
  0xa0   :  { %v61_v11 = vsel %vm54_vm0, %v133_v10, 0.0 }
  0xa1   :  { %62 = vadd.xlane.f32.xlu1 %v61_v11 }
  0xa5   :  { %72 = vadd.xlane.f32.xlu1 %v71_v13 }
 0x12a   :  { %v63_v14 = vpop.xlane.xlu1 %62 }
 0x12b   :  { %134 = vlog2.f32 %v63_v14 }
 0x12e   :  { %v73_v17 = vpop.xlane.xlu1 %72 }
 0x138   :  { %v135_v15 = vpop.eup %134 }
 0x139   :  { %v78_v16 = vmul.f32 0.6931472, %v135_v15 }
 0x13b   :  { %v79_v18 = vsub.f32 %v73_v17, %v78_v16 }
 0x13d   :  { %v80_v19 = vsel %vm76_vm4, %v79_v18, 0.0 }
 0x13e   :  { %v83_v20 = vsel %vm82_vm5, %v80_v19, 0.0 }
 0x13f   :  { %84 = vadd.xlane.f32.xlu1 %v83_v20 }
 0x1c8   :  { %v85_v21 = vpop.xlane.xlu1 %84 }
 0x1c9   :  { %v86_v22 = vrot.slane %v85_v21, 4 }
 0x1cb   :  { %v87_v23 = vadd.f32 %v86_v22, %v85_v21 }
 0x1cd   :  { %v88_v24 = vrot.slane %v87_v23, 2 }
 0x1cf   :  { %v89_v25 = vadd.f32 %v88_v24, %v87_v23 }
 0x1d1   :  { %v90_v26 = vrot.slane %v89_v25, 1 }
 0x1d3   :  { %v91_v27 = vadd.f32 %v90_v26, %v89_v25 }
 0x1d5   :  { %127 = vpush %v91_v27 }
 0x206   :  { %s128_s0 = spop %127 }
 0x207   :  { %101 = sst [smem:[#allocation3]] %s128_s0 }
 0x208   :  { %109 = dma.smem_to_hbm %s147_s1, 16, %s177_s2, [#allocation4]  }
 0x209   :  { %144 = dma.done.wait [#allocation4], 16  }
 0x20a   :  { %145 = vsyncadd [#allocation4], 4294967280 }
 0x20b   :  { %113 = sfence }
 0x20c   :  { %114 = vsyncpa [#allocation4], 1 }

</bundles_post_ra>
